<compile_context>
chip_gen: v7x
topology: tpu7x:2x2x1
jax: 0.10.0
libtpu: 0.0.40
codegen_flags: <defaults>
</compile_context>

<pallas_src>
import functools

import jax
import jax.numpy as jnp
from jax.experimental import pallas as pl
from jax.experimental.pallas import tpu as pltpu


def _round_up(x, m):
    return ((x + m - 1) // m) * m


def _focal_kernel(x_ref, t_ref, w_ref, o_ref, *,
                  gamma, rows, cols, block_rows, block_cols):
    """Elementwise focal loss, folded to an (8, BC) strip per step.

    x_ref, t_ref : (BR, BC) tiles of inputs / targets
    w_ref        : (BR, 1) per-row channel weights (constant across col axis)
    o_ref        : (8, BC) lane-dense partial-sum strip, resident across the
                   column (reduction) grid axis for this row block
    """
    i = pl.program_id(0)
    j = pl.program_id(1)

    @pl.when(j == 0)
    def _():
        o_ref[...] = jnp.zeros_like(o_ref)

    x = x_ref[...].astype(jnp.float32)
    t = t_ref[...].astype(jnp.float32)
    # ((x+1)/2) - ((t+1)/2) == 0.5 * (x - t)
    l1 = 0.5 * jnp.abs(x - t)
    pt = jnp.exp(-l1)
    u = 1.0 - pt

    g = float(gamma)
    if g == 2.0:
        focal = u * u
    elif g.is_integer() and g >= 0.0:
        focal = u ** int(g)                     # integer_pow -> multiply chain
    elif (2.0 * g).is_integer() and g > 0.0:
        focal = (u ** int(g)) * jnp.sqrt(u)     # half-integer: 1 sqrt on EUP
    else:
        # TODO(synk): generic float pow lowers to log+mul+exp (EUP slow path).
        focal = u ** g

    f_loss = w_ref[...].astype(jnp.float32) * focal * l1

    def _strip(v):
        # Fold sublane groups (BR, BC) -> (8, BC): pure VALU adds of aligned
        # static slices (no XLU, no tile-boundary crossing).
        s = v[0:8, :]
        for r0 in range(8, block_rows, 8):
            s = s + v[r0:r0 + 8, :]
        return s

    need_row_mask = (rows % block_rows) != 0
    need_col_mask = (cols % block_cols) != 0

    if not (need_row_mask or need_col_mask):
        o_ref[...] += _strip(f_loss)
    else:
        edge = []
        if need_row_mask:
            edge.append(i == pl.num_programs(0) - 1)
        if need_col_mask:
            edge.append(j == pl.num_programs(1) - 1)
        on_edge = edge[0] if len(edge) == 1 else jnp.logical_or(edge[0], edge[1])

        @pl.when(jnp.logical_not(on_edge))
        def _():
            # Interior blocks: no masking work at runtime.
            o_ref[...] += _strip(f_loss)

        @pl.when(on_edge)
        def _():
            mask = None
            if need_row_mask:
                r_ids = i * block_rows + jax.lax.broadcasted_iota(
                    jnp.int32, (block_rows, block_cols), 0)
                mask = r_ids < rows
            if need_col_mask:
                c_ids = j * block_cols + jax.lax.broadcasted_iota(
                    jnp.int32, (block_rows, block_cols), 1)
                cmask = c_ids < cols
                mask = cmask if mask is None else jnp.logical_and(mask, cmask)
            # jnp.where (select), NOT a zero-multiply: padded garbage may be
            # NaN/Inf and 0*NaN = NaN.
            o_ref[...] += _strip(jnp.where(mask, f_loss, 0.0))


def channel_weighted_focal_loss(inputs, targets, weights, gamma=2.0):
    """inputs, targets: (N, C, H, W); weights: (C,). Returns scalar f32."""
    N, C, H, W = inputs.shape
    count = N * C * H * W

    rows = N * C
    cols = H * W

    # Tiny N*C (e.g. single-image RGB losses): fold even factors of the
    # spatial dim into rows.  Free contiguous reshape; keeps tiles
    # sublane-dense and gives the parallel row axis >= 2 blocks (both v7x TCs).
    reps = 1
    while rows * reps < 64 and cols % 2 == 0 and cols >= 2048:
        reps *= 2
        cols //= 2
    rows = rows * reps

    x2 = inputs.reshape(rows, cols)
    t2 = targets.reshape(rows, cols)
    weights = jnp.asarray(weights, jnp.float32)
    w_rows = jnp.broadcast_to(weights[None, :, None], (N, C, reps)).reshape(rows, 1)

    # Min sublane multiple for the input dtype (8 for f32, 16 for bf16, ...).
    itemsize = jnp.dtype(inputs.dtype).itemsize
    sub = max(8, 32 // itemsize)

    R_pad = _round_up(rows, sub)
    S_pad = _round_up(cols, 128)

    # ~1M elements (~4 MiB f32) per input tile -> per-step pipeline overhead
    # (~0.35 us) is <~5% of DMA time on all of v5e/v6e/v7x.
    target_elems = 1 << 20

    # Row blocking: cap BR at 512 (keeps the in-kernel sublane fold short) and
    # guarantee >= 2 row blocks whenever the row dim is splittable, so the
    # "parallel" axis can be sharded across v7x's two TensorCores.
    BR_cap = 512
    n_row_blocks = pl.cdiv(R_pad, BR_cap)
    if n_row_blocks < 2 and R_pad >= 2 * sub:
        n_row_blocks = 2
    BR = _round_up(pl.cdiv(R_pad, n_row_blocks), sub)

    # Column blocking: fill the tile up to ~target_elems, balanced across
    # column blocks, multiple of 128 (lane-dense).
    bc_cap = max(128, min(S_pad, (target_elems // BR) // 128 * 128))
    n_col_blocks = pl.cdiv(S_pad, bc_cap)
    BC = _round_up(pl.cdiv(S_pad, n_col_blocks), 128)

    grid = (pl.cdiv(rows, BR), pl.cdiv(cols, BC))

    kernel = functools.partial(
        _focal_kernel,
        gamma=float(gamma),
        rows=rows, cols=cols,
        block_rows=BR, block_cols=BC,
    )

    partials = pl.pallas_call(
        kernel,
        out_shape=jax.ShapeDtypeStruct((grid[0] * 8, BC), jnp.float32),
        grid_spec=pltpu.PrefetchScalarGridSpec(
            num_scalar_prefetch=0,
            grid=grid,
            in_specs=[
                pl.BlockSpec((BR, BC), lambda i, j: (i, j)),
                pl.BlockSpec((BR, BC), lambda i, j: (i, j)),
                # Weight column: block index independent of j -> fetched once
                # per row block, not once per grid step.
                pl.BlockSpec((BR, 1), lambda i, j: (i, 0)),
            ],
            # Lane-dense (8, BC) output strip, resident across the column
            # (reduction) axis for each row block.
            out_specs=pl.BlockSpec((8, BC), lambda i, j: (i, 0)),
        ),
        compiler_params=pltpu.CompilerParams(
            # Row blocks independent -> parallel (both TCs on v7x); column
            # axis carries the resident output -> arbitrary, and last.
            dimension_semantics=("parallel", "arbitrary"),
            # Raise the scoped-VMEM default (16 MiB v5e / 32 MiB v6e,v7x);
            # 48 MiB stays under v7x's 64 MiB physical VMEM.
            vmem_limit_bytes=48 * 1024 * 1024,
        ),
    )(x2, t2, w_rows)

    # Tiny final reduction of per-row-block lane partials; mean scale computed
    # in double precision on the host.
    return jnp.sum(partials) * (1.0 / count)


def _reference(inputs, targets, weights, gamma=2.0):
    x = (inputs + 1.0) / 2.0
    t = (targets + 1.0) / 2.0
    l1 = jnp.abs(x - t)
    pt = jnp.exp(-l1)
    w = jnp.asarray(weights, jnp.float32).reshape(1, -1, 1, 1)
    return jnp.mean(w * (1.0 - pt) ** gamma * l1)


def _run_case(key, shape, gamma):
    k1, k2, k3 = jax.random.split(key, 3)
    N, C, H, W = shape
    inputs = jax.random.uniform(k1, shape, jnp.float32, -1.0, 1.0)
    targets = jax.random.uniform(k2, shape, jnp.float32, -1.0, 1.0)
    weights = jax.random.uniform(k3, (C,), jnp.float32, 0.5, 2.0)

    loss = channel_weighted_focal_loss(inputs, targets, weights, gamma)
    jax.block_until_ready(loss)

    ref = _reference(inputs, targets, weights, gamma)
    assert jnp.allclose(loss, ref, rtol=2e-5, atol=1e-6), (shape, gamma, loss, ref)


if __name__ == "__main__":
    key = jax.random.PRNGKey(0)
    k1, k2, k3 = jax.random.split(key, 3)

    # 1) Canonical small shape, gamma=2 (integer fast path), exact tiling,
    #    single grid step.
    _run_case(k1, (2, 4, 16, 16), 2.0)
    # 2) Multi-row-block grid: ragged rows + ragged cols, edge-gated masking,
    #    parallel row axis with 2 blocks.
    _run_case(k2, (2, 130, 33, 33), 2.0)
    # 3) Half-integer gamma (sqrt fast path) + both edge masks + row split
    #    for parallelism.
    _run_case(k3, (3, 5, 17, 19), 1.5)

    print("KERNEL_OK")
</pallas_src>

<mosaic_0001>
module attributes {stable_mosaic.version = 11 : i64} {
  func.func @_focal_kernel(%arg0: i32, %arg1: i32, %arg2: memref<8x256xf32, #tpu.memory_space<vmem>>, %arg3: memref<8x256xf32, #tpu.memory_space<vmem>>, %arg4: memref<8x1xf32, #tpu.memory_space<vmem>>, %arg5: memref<8x256xf32, #tpu.memory_space<vmem>>) attributes {dimension_semantics = [#tpu.dimension_semantics<parallel>, #tpu.dimension_semantics<arbitrary>], iteration_bounds = array<i64: 1, 1>, scalar_prefetch = 0 : i64, scratch_operands = 0 : i64, tpu.core_type = #tpu.core_type<tc>, window_params = [{transform_indices = @transform_0, window_bounds = array<i64: 8, 256>}, {transform_indices = @transform_1, window_bounds = array<i64: 8, 256>}, {transform_indices = @transform_2, window_bounds = array<i64: 8, 1>}, {transform_indices = @transform_3, window_bounds = array<i64: 8, 256>}]} {
    %c0_i32 = arith.constant 0 : i32
    %0 = arith.cmpi eq, %arg1, %c0_i32 : i32
    %1 = arith.extui %0 : i1 to i32
    %c0_i32_0 = arith.constant 0 : i32
    %2 = arith.cmpi ne, %1, %c0_i32_0 : i32
    scf.if %2 {
      %cst_12 = arith.constant 0.000000e+00 : f32
      %22 = vector.broadcast %cst_12 : f32 to vector<8x256xf32>
      %c0_13 = arith.constant 0 : index
      %c0_14 = arith.constant 0 : index
      %23 = vector.load %arg5[%c0_13, %c0_14] : memref<8x256xf32, #tpu.memory_space<vmem>>, vector<8x256xf32>
      tpu.vector_store %arg5[%c0_13, %c0_14], %22 {strides = array<i32>} : memref<8x256xf32, #tpu.memory_space<vmem>>, vector<8x256xf32>,
    } else {
    }
    %c0 = arith.constant 0 : index
    %c0_1 = arith.constant 0 : index
    %3 = vector.load %arg2[%c0, %c0_1] : memref<8x256xf32, #tpu.memory_space<vmem>>, vector<8x256xf32>
    %c0_2 = arith.constant 0 : index
    %c0_3 = arith.constant 0 : index
    %4 = vector.load %arg3[%c0_2, %c0_3] : memref<8x256xf32, #tpu.memory_space<vmem>>, vector<8x256xf32>
    %5 = arith.subf %3, %4 : vector<8x256xf32>
    %6 = math.absf %5 : vector<8x256xf32>
    %cst = arith.constant 5.000000e-01 : f32
    %7 = vector.broadcast %cst : f32 to vector<8x256xf32>
    %8 = arith.mulf %7, %6 : vector<8x256xf32>
    %cst_4 = arith.constant 0.000000e+00 : f32
    %9 = vector.broadcast %cst_4 : f32 to vector<8x256xf32>
    %10 = arith.subf %9, %8 : vector<8x256xf32>
    %11 = math.exp %10 : vector<8x256xf32>
    %cst_5 = arith.constant 1.000000e+00 : f32
    %12 = vector.broadcast %cst_5 : f32 to vector<8x256xf32>
    %13 = arith.subf %12, %11 : vector<8x256xf32>
    %14 = arith.mulf %13, %13 : vector<8x256xf32>
    %c0_6 = arith.constant 0 : index
    %c0_7 = arith.constant 0 : index
    %15 = vector.load %arg4[%c0_6, %c0_7] : memref<8x1xf32, #tpu.memory_space<vmem>>, vector<8x1xf32>
    %16 = vector.broadcast %15 : vector<8x1xf32> to vector<8x256xf32>
    %17 = arith.mulf %16, %14 : vector<8x256xf32>
    %18 = arith.mulf %17, %8 : vector<8x256xf32>
    %c0_8 = arith.constant 0 : index
    %c0_9 = arith.constant 0 : index
    %19 = vector.load %arg5[%c0_8, %c0_9] : memref<8x256xf32, #tpu.memory_space<vmem>>, vector<8x256xf32>
    %20 = arith.addf %19, %18 : vector<8x256xf32>
    %c0_10 = arith.constant 0 : index
    %c0_11 = arith.constant 0 : index
    %21 = vector.load %arg5[%c0_10, %c0_11] : memref<8x256xf32, #tpu.memory_space<vmem>>, vector<8x256xf32>
    tpu.vector_store %arg5[%c0_10, %c0_11], %20 {strides = array<i32>} : memref<8x256xf32, #tpu.memory_space<vmem>>, vector<8x256xf32>,
    return
  }
  func.func @transform_0(%arg0: i32, %arg1: i32) -> (i32, i32) {
    %c0_i32 = arith.constant 0 : i32
    return %arg0, %arg1 : i32, i32
  }
  func.func @transform_1(%arg0: i32, %arg1: i32) -> (i32, i32) {
    %c0_i32 = arith.constant 0 : i32
    return %arg0, %arg1 : i32, i32
  }
  func.func @transform_2(%arg0: i32, %arg1: i32) -> (i32, i32) {
    %c0_i32 = arith.constant 0 : i32
    %c0_i32_0 = arith.constant 0 : i32
    return %arg0, %c0_i32 : i32, i32
  }
  func.func @transform_3(%arg0: i32, %arg1: i32) -> (i32, i32) {
    %c0_i32 = arith.constant 0 : i32
    %c0_i32_0 = arith.constant 0 : i32
    return %arg0, %c0_i32 : i32, i32
  }
}

</mosaic_0001>

<bundles_post_ra>
// kernel: tpu_custom_call.1
= control target key start
LH: loop header
LB: loop body
LE: loop exit
PB: predicated region body
PF: predicated region fallthrough
CT: control target
= control target key end

     0   :  { %8 = vsyncpa [#allocation3], 0  ;;  %s242_s0 = inlined_call_operand.hbm [shape: f32[8,256], index: 0, kind: input, shape index: {}]   ;;  %s243_s1 = inlined_call_operand.hbm [shape: f32[8,256], index: 1, kind: input, shape index: {}]   ;;  %s244_s2 = inlined_call_operand.vmem [shape: f32[8,1], index: 2, kind: input, shape index: {}]   ;;  %s245_s3 = inlined_call_operand.hbm [shape: f32[8,256], index: 3, kind: output, shape index: {}]  }
   0x1   :  { %9 = vsyncpa [#allocation6], 0 }
   0x2   :  { %10 = vsyncpa [#allocation4], 0  ;;  %s179_s12 = smov [#allocation2]   ;;  %s180_s14 = smov [#allocation5]  }
   0x3   :  { %s17_s13 = sshll.u32 %s179_s12, 4  ;;  %s27_s15 = sshll.u32 %s180_s14, 4  ;;  %s18_s13 = int_to_ptr.vmem [resolvable:$true] %s17_s13  ;;  %s28_s15 = int_to_ptr.vmem [resolvable:$true] %s27_s15 }
   0x4   :  { %s107_s18 = scalar_lea.hbm %s242_s0, 256 }
   0x5   :  { %p108_p0 = scmp.ne.s32.totalorder %s242_s0, %s107_s18  ;;  %p111_p1 = scmp.lt.u32.totalorder %s107_s18, %s242_s0 }
   0x7   :  { %p113_p2 = pnand %p111_p1, %p108_p0 }
   0x9   :  { %116 = shalt.err (!%p113_p2)
}
   0xa   :  { %s117_s23 = scalar_lea.vmem %s18_s13, 256  ;;  %p122_p4 = scmp.lt.s32.totalorder %s18_s13, %s18_s13 }
   0xb   :  { %p118_p3 = scmp.ne.s32.totalorder %s18_s13, %s117_s23  ;;  %p123_p5 = scmp.lt.s32.totalorder %s117_s23, %s117_s23 }
   0xd   :  { %p124_p6 = por %p123_p5, %p122_p4 }
   0xf   :  { %p125_p7 = pnand %p124_p6, %p118_p3 }
  0x11   :  { %128 = shalt.err (!%p125_p7)
}
  0x12   :  { %20 = dma.hbm_to_vmem [thread:$0]  %s242_s0, 256, %s18_s13, [#allocation3]  }
  0x13   :  { %s129_s28 = scalar_lea.hbm %s243_s1, 256 }
  0x14   :  { %p130_p8 = scmp.ne.s32.totalorder %s243_s1, %s129_s28  ;;  %p133_p9 = scmp.lt.u32.totalorder %s129_s28, %s243_s1 }
  0x16   :  { %p135_p10 = pnand %p133_p9, %p130_p8 }
  0x18   :  { %138 = shalt.err (!%p135_p10)
}
  0x19   :  { %s139_s6 = scalar_lea.vmem %s28_s15, 256  ;;  %p144_p12 = scmp.lt.s32.totalorder %s28_s15, %s28_s15 }
  0x1a   :  { %p140_p11 = scmp.ne.s32.totalorder %s28_s15, %s139_s6  ;;  %p145_p13 = scmp.lt.s32.totalorder %s139_s6, %s139_s6 }
  0x1c   :  { %p146_p0 = por %p145_p13, %p144_p12 }
  0x1e   :  { %p147_p1 = pnand %p146_p0, %p140_p11 }
  0x20   :  { %150 = shalt.err (!%p147_p1)
}
  0x21   :  { %30 = dma.hbm_to_vmem [thread:$0]  %s243_s1, 256, %s28_s15, [#allocation6]  }
  0x22   :  { %173 = dma.done.wait [#allocation3], 256  }
  0x23   :  { %174 = vsyncadd [#allocation3], 4294967040 }
  0x24   :  { %175 = dma.done.wait [#allocation6], 256  }
  0x25   :  { %176 = vsyncadd [#allocation6], 4294967040  ;;  %v181_v0 = vmov 0   ;;  %v65_v1 = vld [vmem:[%s244_s2] sm:$0xff]  ;;  %v47_v3 = vld [vmem:[#allocation5] sm:$0xff]  ;;  %s182_s1 = smov [#allocation7]  }
  0x26   :  { %102 = vset.pattern.permute.xlu0 %v181_v0  ;;  %v45_v2 = vld [vmem:[#allocation2] sm:$0xff]  ;;  %v46_v4 = vld [vmem:[#allocation2 + $0x8] sm:$0xff]  ;;  %v48_v5 = vld [vmem:[#allocation5 + $0x8] sm:$0xff]  ;;  %s87_s2 = sshll.u32 %s182_s1, 4  ;;  %s88_s2 = int_to_ptr.vmem [resolvable:$true] %s87_s2 }
  0x27   :  { %68 = vperm.xlu0 %102, %v65_v1   ;;  %v49_v6 = vsub.f32 %v45_v2, %v47_v3  ;;  %v50_v7 = vsub.f32 %v46_v4, %v48_v5  ;;  %s151_s10 = scalar_lea.vmem %s88_s2, 256  ;;  %p156_p3 = scmp.lt.s32.totalorder %s88_s2, %s88_s2 }
  0x28   :  { %p152_p2 = scmp.ne.s32.totalorder %s88_s2, %s151_s10  ;;  %p157_p4 = scmp.lt.s32.totalorder %s151_s10, %s151_s10 }
  0x29   :  { %v51_v8 = vand.u32 2147483647, %v49_v6  ;;  %v52_v9 = vand.u32 2147483647, %v50_v7 }
  0x2a   :  { %p158_p5 = por %p157_p4, %p156_p3 }
  0x2b   :  { %v53_v10 = vmul.f32 0.5, %v51_v8  ;;  %v54_v11 = vmul.f32 0.5, %v52_v9 }
  0x2c   :  { %p159_p6 = pnand %p158_p5, %p152_p2 }
  0x2d   :  { %v55_v12 = vsub.f32 0.0, %v53_v10  ;;  %v56_v13 = vsub.f32 0.0, %v54_v11 }
  0x2f   :  { %v57_v14 = vmul.f32 1.442695, %v55_v12  ;;  %v59_v15 = vmul.f32 1.442695, %v56_v13 }
  0x31   :  { %103 = vpow2.f32 %v57_v14 }
  0x32   :  { %105 = vpow2.f32 %v59_v15 }
  0x3b   :  { %v104_v16 = vpop.eup %103 }
  0x3c   :  { %v106_v17 = vpop.eup %105  ;;  %v61_v18 = vsub.f32 1.0, %v104_v16 }
  0x3d   :  { %v62_v19 = vsub.f32 1.0, %v106_v17 }
  0x3e   :  { %v63_v20 = vmul.f32 %v61_v18, %v61_v18 }
  0x3f   :  { %v64_v21 = vmul.f32 %v62_v19, %v62_v19 }
  0xa6   :  { %v69_v22 = vpop.permute.xlu0 %68 }
  0xa7   :  { %v71_v23 = vmul.f32 %v69_v22, %v63_v20  ;;  %v72_v24 = vmul.f32 %v69_v22, %v64_v21 }
  0xa9   :  { %v73_v25 = vmul.f32 %v71_v23, %v53_v10  ;;  %v74_v26 = vmul.f32 %v72_v24, %v54_v11 }
  0xab   :  { %79 = vst [vmem:[#allocation7] sm:$0xff] %v73_v25  ;;  %80 = vst [vmem:[#allocation7 + $0x8] sm:$0xff] %v74_v26 }
  0xac   :  { %162 = shalt.err (!%p159_p6)
}
  0xad   :  { %s163_s13 = scalar_lea.hbm %s245_s3, 256 }
  0xae   :  { %p164_p7 = scmp.ne.s32.totalorder %s245_s3, %s163_s13  ;;  %p167_p8 = scmp.lt.u32.totalorder %s163_s13, %s245_s3 }
  0xb0   :  { %p169_p9 = pnand %p167_p8, %p164_p7 }
  0xb2   :  { %172 = shalt.err (!%p169_p9)
}
  0xb3   :  { %90 = dma.vmem_to_hbm [thread:$0]  %s88_s2, 256, %s245_s3, [#allocation4]  }
  0xb4   :  { %177 = dma.done.wait [#allocation4], 256  }
  0xb5   :  { %178 = vsyncadd [#allocation4], 4294967040 }
  0xb6   :  { %94 = vsyncpa [#allocation3], 1 }
  0xb7   :  { %95 = vsyncpa [#allocation6], 1 }
  0xb8   :  { %96 = vsyncpa [#allocation4], 1 }

</bundles_post_ra>
